<compile_context>
chip_gen: v5e
topology: v5e:2x2
jax: 0.10.0
libtpu: 0.0.40
codegen_flags: <defaults>
</compile_context>

<pallas_src>
import functools

import jax
import jax.numpy as jnp
from jax.experimental import pallas as pl
from jax.experimental.pallas import tpu as pltpu

NUM_INPUTS = 16   # vocabulary size
HIDDEN = 32       # hidden_size
SEQ_LEN = 8       # demo sequence length


def gru_seq_kernel(tok_ref,            # scalar-prefetch token ids (SMEM), unused in body
                   gi_ref,             # (1, 1, 3H) gathered row of precomputed input gates
                   whh_ref,            # (H, 3H)   fused hidden->gate weights (transposed)
                   bhh_ref,            # (1, 3H)   fused hidden biases
                   h0_ref,             # (1, H)    initial hidden state
                   out_ref,            # (1, 1, H) per-step output block
                   h_scr,              # VMEM scratch (1, H): hidden carried across steps
                   *, hidden_size):
    H = hidden_size
    t = pl.program_id(0)

    @pl.when(t == 0)
    def _():
        h_scr[...] = h0_ref[...]

    h = h_scr[...]                                       # (1, H)
    gi = gi_ref[0]                                       # (1, 3H) = emb @ W_ih^T + b_ih
    gh = jnp.dot(h, whh_ref[...],
                 preferred_element_type=jnp.float32) + bhh_ref[...]   # (1, 3H)

    # r and z share one sigmoid over the first 2H lanes.
    rz = jax.nn.sigmoid(gi[:, :2 * H] + gh[:, :2 * H])   # (1, 2H)
    r = rz[:, :H]
    z = rz[:, H:]
    n = jnp.tanh(gi[:, 2 * H:] + r * gh[:, 2 * H:])
    h_new = (1.0 - z) * n + z * h                        # (1, H)

    h_scr[...] = h_new
    out_ref[0] = h_new.astype(out_ref.dtype)


def init_params(key, num_inputs=NUM_INPUTS, hidden=HIDDEN):
    k1, k2, k3, k4, k5 = jax.random.split(key, 5)
    bound = 1.0 / jnp.sqrt(jnp.float32(hidden))
    return {
        # nn.Embedding default init: N(0, 1)
        "embedding": jax.random.normal(k1, (num_inputs, hidden), jnp.float32),
        # nn.GRU default init: U(-1/sqrt(H), 1/sqrt(H)); gate order [r, z, n]
        "w_ih": jax.random.uniform(k2, (3 * hidden, hidden), jnp.float32, -bound, bound),
        "w_hh": jax.random.uniform(k3, (3 * hidden, hidden), jnp.float32, -bound, bound),
        "b_ih": jax.random.uniform(k4, (3 * hidden,), jnp.float32, -bound, bound),
        "b_hh": jax.random.uniform(k5, (3 * hidden,), jnp.float32, -bound, bound),
    }


def pack_params(params):
    """One-time packing: precompute input-gate table, fuse hidden-side gates."""
    emb = params["embedding"]                        # (V, H)
    V, H = emb.shape
    w_ih, w_hh = params["w_ih"], params["w_hh"]      # (3H, H) each
    b_ih, b_hh = params["b_ih"], params["b_hh"]      # (3H,)  each

    # gi_table[v] = emb[v] @ W_ih^T + b_ih   (gate order [r, z, n] preserved)
    gi_table = (emb @ w_ih.T + b_ih).astype(jnp.float32)        # (V, 3H)
    return {
        "gi_table": gi_table.reshape(V, 1, 3 * H),              # (V, 1, 3H)
        "w_hh_t": w_hh.T.astype(jnp.float32),                   # (H, 3H)
        "b_hh": b_hh.reshape(1, 3 * H).astype(jnp.float32),     # (1, 3H)
        "hidden_size": H,
        "vocab": V,
    }


def encoder_forward_seq(tokens, hidden, packed):
    """Run a whole token sequence through the GRU in a single pallas_call.

    tokens: int32 (T,), hidden: (1, 1, H) float32.
    Returns (outputs, hidden_final): outputs (T, 1, 1, H), hidden_final (1, 1, H).
    """
    H = packed["hidden_size"]
    gi_table, w_hh_t, b_hh = packed["gi_table"], packed["w_hh_t"], packed["b_hh"]

    tokens = jnp.asarray(tokens, jnp.int32).reshape(-1)
    T = tokens.shape[0]
    h0 = hidden.reshape(1, H).astype(jnp.float32)

    outs = pl.pallas_call(
        functools.partial(gru_seq_kernel, hidden_size=H),
        out_shape=jax.ShapeDtypeStruct((T, 1, H), jnp.float32),
        grid_spec=pltpu.PrefetchScalarGridSpec(
            num_scalar_prefetch=1,
            grid=(T,),
            in_specs=[
                # Row gather of the precomputed input-gate table via scalar prefetch.
                pl.BlockSpec((1, 1, 3 * H), lambda t, tok: (tok[t], 0, 0)),
                # Fused hidden-side weights / biases: VMEM-resident across all steps.
                pl.BlockSpec((H, 3 * H), lambda t, tok: (0, 0)),
                pl.BlockSpec((1, 3 * H), lambda t, tok: (0, 0)),
                pl.BlockSpec((1, H), lambda t, tok: (0, 0)),
            ],
            out_specs=pl.BlockSpec((1, 1, H), lambda t, tok: (t, 0, 0)),
            scratch_shapes=[pltpu.VMEM((1, H), jnp.float32)],
        ),
        compiler_params=pltpu.CompilerParams(
            dimension_semantics=("arbitrary",)),   # sequential recurrence
    )(tokens, gi_table, w_hh_t, b_hh, h0)

    outputs = outs.reshape(T, 1, 1, H)
    hidden_final = outs[T - 1].reshape(1, 1, H)
    return outputs, hidden_final


def encoder_forward(token, hidden, packed):
    """Exact Encoder.forward semantics: one token, returns (output, hidden), each (1,1,H)."""
    tok = jnp.asarray(token, jnp.int32).reshape(1)
    outs, h_new = encoder_forward_seq(tok, hidden, packed)
    out = outs[0]                      # (1, 1, H); output == hidden for this module
    return out, h_new


def encoder_forward_ref(token, hidden, params):
    """Pure-JAX reference matching torch.nn.GRU semantics."""
    emb = params["embedding"]
    H = emb.shape[1]
    x = emb[jnp.asarray(token, jnp.int32).reshape(())].reshape(1, H)
    h = hidden.reshape(1, H)
    w_ih, w_hh, b_ih, b_hh = params["w_ih"], params["w_hh"], params["b_ih"], params["b_hh"]
    gi = x @ w_ih.T + b_ih
    gh = h @ w_hh.T + b_hh
    i_r, i_z, i_n = gi[:, :H], gi[:, H:2 * H], gi[:, 2 * H:]
    h_r, h_z, h_n = gh[:, :H], gh[:, H:2 * H], gh[:, 2 * H:]
    r = jax.nn.sigmoid(i_r + h_r)
    z = jax.nn.sigmoid(i_z + h_z)
    n = jnp.tanh(i_n + r * h_n)
    h_new = (1.0 - z) * n + z * h
    return h_new.reshape(1, 1, H), h_new.reshape(1, 1, H)


if __name__ == "__main__":
    key = jax.random.PRNGKey(0)
    params = init_params(key)
    packed = pack_params(params)          # one-time packing (out of the per-token path)

    hidden0 = jnp.zeros((1, 1, HIDDEN), jnp.float32)   # init_hidden()

    # Single-step module semantics (two chained calls exercise the z*h path).
    out1, hid1 = encoder_forward(jnp.array([3], jnp.int32), hidden0, packed)
    out2, hid2 = encoder_forward(jnp.array([7], jnp.int32), hid1, packed)

    # Whole sequence in ONE pallas_call (weights resident, hidden carried in VMEM scratch).
    seq = jnp.array([3, 7, 1, 0, 15, 4, 9, 2], jnp.int32)
    outs_seq, hid_seq = encoder_forward_seq(seq, hidden0, packed)
    jax.block_until_ready((out1, hid1, out2, hid2, outs_seq, hid_seq))

    # Pure-JAX reference.
    r_out1, r_hid1 = encoder_forward_ref(jnp.array([3]), hidden0, params)
    r_out2, r_hid2 = encoder_forward_ref(jnp.array([7]), r_hid1, params)
    r_h = hidden0
    r_outs = []
    for i in range(SEQ_LEN):
        r_o, r_h = encoder_forward_ref(seq[i], r_h, params)
        r_outs.append(r_o)
    r_outs = jnp.stack(r_outs, axis=0)    # (T, 1, 1, H)

    assert out1.shape == (1, 1, HIDDEN) and hid1.shape == (1, 1, HIDDEN)
    assert outs_seq.shape == (SEQ_LEN, 1, 1, HIDDEN) and hid_seq.shape == (1, 1, HIDDEN)
    assert jnp.allclose(out1, r_out1, atol=1e-4, rtol=1e-4)
    assert jnp.allclose(hid1, r_hid1, atol=1e-4, rtol=1e-4)
    assert jnp.allclose(out2, r_out2, atol=1e-4, rtol=1e-4)
    assert jnp.allclose(hid2, r_hid2, atol=1e-4, rtol=1e-4)
    assert jnp.allclose(outs_seq, r_outs, atol=1e-4, rtol=1e-4)
    assert jnp.allclose(hid_seq, r_h, atol=1e-4, rtol=1e-4)

    print("KERNEL_OK")
</pallas_src>

<mosaic_0001>
module attributes {stable_mosaic.version = 11 : i64} {
  func.func @gru_seq_kernel(%arg0: i32, %arg1: memref<1xi32, #tpu.memory_space<smem>>, %arg2: memref<1x1x96xf32, #tpu.memory_space<vmem>>, %arg3: memref<32x96xf32, #tpu.memory_space<vmem>>, %arg4: memref<1x96xf32, #tpu.memory_space<vmem>>, %arg5: memref<1x32xf32, #tpu.memory_space<vmem>>, %arg6: memref<1x1x32xf32, #tpu.memory_space<vmem>>, %arg7: memref<1x32xf32, #tpu.memory_space<vmem>>) attributes {dimension_semantics = [#tpu.dimension_semantics<arbitrary>], iteration_bounds = array<i64: 1>, scalar_prefetch = 1 : i64, scratch_operands = 1 : i64, tpu.core_type = #tpu.core_type<tc>, window_params = [{transform_indices = @transform_0, window_bounds = array<i64: 1, 1, 96>}, {pipeline_mode = #tpu.pipeline_mode<synchronous>, transform_indices = @transform_1, window_bounds = array<i64: 32, 96>}, {pipeline_mode = #tpu.pipeline_mode<synchronous>, transform_indices = @transform_2, window_bounds = array<i64: 1, 96>}, {pipeline_mode = #tpu.pipeline_mode<synchronous>, transform_indices = @transform_3, window_bounds = array<i64: 1, 32>}, {transform_indices = @transform_4, window_bounds = array<i64: 1, 1, 32>}]} {
    %c0_i32 = arith.constant 0 : i32
    %0 = arith.cmpi eq, %arg0, %c0_i32 : i32
    %1 = arith.extui %0 : i1 to i32
    %c0_i32_0 = arith.constant 0 : i32
    %2 = arith.cmpi ne, %1, %c0_i32_0 : i32
    scf.if %2 {
      %c0_16 = arith.constant 0 : index
      %c0_17 = arith.constant 0 : index
      %34 = vector.load %arg5[%c0_16, %c0_17] : memref<1x32xf32, #tpu.memory_space<vmem>>, vector<1x32xf32>
      %c0_18 = arith.constant 0 : index
      %c0_19 = arith.constant 0 : index
      %35 = vector.load %arg7[%c0_18, %c0_19] : memref<1x32xf32, #tpu.memory_space<vmem>>, vector<1x32xf32>
      tpu.vector_store %arg7[%c0_18, %c0_19], %34 {strides = array<i32>} : memref<1x32xf32, #tpu.memory_space<vmem>>, vector<1x32xf32>,
    } else {
    }
    %c0 = arith.constant 0 : index
    %c0_1 = arith.constant 0 : index
    %3 = vector.load %arg7[%c0, %c0_1] : memref<1x32xf32, #tpu.memory_space<vmem>>, vector<1x32xf32>
    %c0_2 = arith.constant 0 : index
    %c0_3 = arith.constant 0 : index
    %c0_4 = arith.constant 0 : index
    %4 = vector.load %arg2[%c0_2, %c0_3, %c0_4] : memref<1x1x96xf32, #tpu.memory_space<vmem>>, vector<1x1x96xf32>
    %5 = vector.shape_cast %4 : vector<1x1x96xf32> to vector<1x96xf32>
    %c0_5 = arith.constant 0 : index
    %c0_6 = arith.constant 0 : index
    %6 = vector.load %arg3[%c0_5, %c0_6] : memref<32x96xf32, #tpu.memory_space<vmem>>, vector<32x96xf32>
    %cst = arith.constant dense<0.000000e+00> : vector<1x96xf32>
    %7 = tpu.matmul %3, %6, %cst {dimension_numbers = #tpu.dot_dimension_numbers<[1], [0], [0], [1], [0, 0, 1, 1], [], []>} : vector<1x32xf32>, vector<32x96xf32>, vector<1x96xf32> -> vector<1x96xf32>
    %c0_7 = arith.constant 0 : index
    %c0_8 = arith.constant 0 : index
    %8 = vector.load %arg4[%c0_7, %c0_8] : memref<1x96xf32, #tpu.memory_space<vmem>>, vector<1x96xf32>
    %9 = arith.addf %7, %8 : vector<1x96xf32>
    %10 = vector.extract_strided_slice %5 {offsets = [0, 0], sizes = [1, 64], strides = [1, 1]} : vector<1x96xf32> to vector<1x64xf32>
    %11 = vector.extract_strided_slice %9 {offsets = [0, 0], sizes = [1, 64], strides = [1, 1]} : vector<1x96xf32> to vector<1x64xf32>
    %12 = arith.addf %10, %11 : vector<1x64xf32>
    %13 = arith.negf %12 : vector<1x64xf32>
    %14 = math.exp %13 : vector<1x64xf32>
    %cst_9 = arith.constant 1.000000e+00 : f32
    %15 = vector.broadcast %cst_9 : f32 to vector<1x64xf32>
    %16 = arith.addf %15, %14 : vector<1x64xf32>
    %17 = arith.divf %15, %16 : vector<1x64xf32>
    %18 = vector.extract_strided_slice %17 {offsets = [0, 0], sizes = [1, 32], strides = [1, 1]} : vector<1x64xf32> to vector<1x32xf32>
    %19 = vector.extract_strided_slice %17 {offsets = [0, 32], sizes = [1, 32], strides = [1, 1]} : vector<1x64xf32> to vector<1x32xf32>
    %20 = vector.extract_strided_slice %5 {offsets = [0, 64], sizes = [1, 32], strides = [1, 1]} : vector<1x96xf32> to vector<1x32xf32>
    %21 = vector.extract_strided_slice %9 {offsets = [0, 64], sizes = [1, 32], strides = [1, 1]} : vector<1x96xf32> to vector<1x32xf32>
    %22 = arith.mulf %18, %21 : vector<1x32xf32>
    %23 = arith.addf %20, %22 : vector<1x32xf32>
    %24 = math.tanh %23 : vector<1x32xf32>
    %cst_10 = arith.constant 1.000000e+00 : f32
    %25 = vector.broadcast %cst_10 : f32 to vector<1x32xf32>
    %26 = arith.subf %25, %19 : vector<1x32xf32>
    %27 = arith.mulf %26, %24 : vector<1x32xf32>
    %28 = arith.mulf %19, %3 : vector<1x32xf32>
    %29 = arith.addf %27, %28 : vector<1x32xf32>
    %c0_11 = arith.constant 0 : index
    %c0_12 = arith.constant 0 : index
    %30 = vector.load %arg7[%c0_11, %c0_12] : memref<1x32xf32, #tpu.memory_space<vmem>>, vector<1x32xf32>
    tpu.vector_store %arg7[%c0_11, %c0_12], %29 {strides = array<i32>} : memref<1x32xf32, #tpu.memory_space<vmem>>, vector<1x32xf32>,
    %c0_13 = arith.constant 0 : index
    %c0_14 = arith.constant 0 : index
    %c0_15 = arith.constant 0 : index
    %31 = vector.load %arg6[%c0_13, %c0_14, %c0_15] : memref<1x1x32xf32, #tpu.memory_space<vmem>>, vector<1x1x32xf32>
    %32 = vector.shape_cast %31 : vector<1x1x32xf32> to vector<1x32xf32>
    %33 = vector.shape_cast %29 : vector<1x32xf32> to vector<1x1x32xf32>
    tpu.vector_store %arg6[%c0_13, %c0_14, %c0_15], %33 {strides = array<i32>} : memref<1x1x32xf32, #tpu.memory_space<vmem>>, vector<1x1x32xf32>,
    return
  }
  func.func @transform_0(%arg0: i32, %arg1: memref<1xi32, #tpu.memory_space<smem>>) -> (i32, i32, i32) {
    %0 = arith.index_cast %arg0 : i32 to index
    %1 = memref.load %arg1[%0] : memref<1xi32, #tpu.memory_space<smem>>
    %c0_i32 = arith.constant 0 : i32
    %c0_i32_0 = arith.constant 0 : i32
    %c0_i32_1 = arith.constant 0 : i32
    return %1, %c0_i32, %c0_i32_0 : i32, i32, i32
  }
  func.func @transform_1(%arg0: i32, %arg1: memref<1xi32, #tpu.memory_space<smem>>) -> (i32, i32) {
    %c0_i32 = arith.constant 0 : i32
    %c0_i32_0 = arith.constant 0 : i32
    %c0_i32_1 = arith.constant 0 : i32
    return %c0_i32, %c0_i32_0 : i32, i32
  }
  func.func @transform_2(%arg0: i32, %arg1: memref<1xi32, #tpu.memory_space<smem>>) -> (i32, i32) {
    %c0_i32 = arith.constant 0 : i32
    %c0_i32_0 = arith.constant 0 : i32
    %c0_i32_1 = arith.constant 0 : i32
    return %c0_i32, %c0_i32_0 : i32, i32
  }
  func.func @transform_3(%arg0: i32, %arg1: memref<1xi32, #tpu.memory_space<smem>>) -> (i32, i32) {
    %c0_i32 = arith.constant 0 : i32
    %c0_i32_0 = arith.constant 0 : i32
    %c0_i32_1 = arith.constant 0 : i32
    return %c0_i32, %c0_i32_0 : i32, i32
  }
  func.func @transform_4(%arg0: i32, %arg1: memref<1xi32, #tpu.memory_space<smem>>) -> (i32, i32, i32) {
    %c0_i32 = arith.constant 0 : i32
    %c0_i32_0 = arith.constant 0 : i32
    %c0_i32_1 = arith.constant 0 : i32
    return %arg0, %c0_i32, %c0_i32_0 : i32, i32, i32
  }
}

</mosaic_0001>

<bundles_post_ra>
// kernel: tpu_custom_call.1
= control target key start
LH: loop header
LB: loop body
LE: loop exit
PB: predicated region body
PF: predicated region fallthrough
CT: control target
= control target key end

     0   :  { %11 = vsyncpa [#allocation6], 0  ;;  %s319_s0 = inlined_call_operand.<no memory space> [shape: s32[1], index: 0, kind: input, shape index: {}]   ;;  %s320_s1 = inlined_call_operand.hbm [shape: f32[16,1,96], index: 1, kind: input, shape index: {}]   ;;  %s321_s2 = inlined_call_operand.hbm [shape: f32[32,96], index: 2, kind: input, shape index: {}]   ;;  %s322_s3 = inlined_call_operand.vmem [shape: f32[1,96], index: 3, kind: input, shape index: {}]   ;;  %s323_s4 = inlined_call_operand.vmem [shape: f32[1,32], index: 4, kind: input, shape index: {}]   ;;  %s324_s5 = inlined_call_operand.hbm [shape: f32[1,1,32], index: 5, kind: output, shape index: {}]  }
   0x1   :  { %12 = vsyncpa [#allocation9], 0 }
   0x2   :  { %13 = vsyncpa [#allocation7], 0  ;;  %s19_s22 = scalar_lea.hbm %s320_s1, %s319_s0  ;;  %s254_s24 = smov [#allocation5]  }
   0x3   :  { %s21_s23 = sshll.u32 %s19_s22, 4  ;;  %s23_s25 = sshll.u32 %s254_s24, 4  ;;  %s22_s23 = int_to_ptr.hbm [resolvable:$true] %s21_s23  ;;  %s24_s25 = int_to_ptr.vmem [resolvable:$true] %s23_s25 }
   0x4   :  { %s176_s26 = sshra.s32 %s22_s23, 4  ;;  %s180_s30 = scalar_lea.hbm %s320_s1, 16  ;;  %s177_s26 = int_to_ptr.hbm [resolvable:$true] %s176_s26 }
   0x5   :  { %s178_s27 = scalar_lea.hbm %s177_s26, 1  ;;  %p181_p1 = scmp.lt.s32.totalorder %s177_s26, %s320_s1 }
   0x6   :  { %p179_p0 = scmp.ne.s32.totalorder %s177_s26, %s178_s27  ;;  %p182_p2 = scmp.lt.s32.totalorder %s180_s30, %s178_s27 }
   0x8   :  { %p183_p3 = por %p182_p2, %p181_p1 }
   0xa   :  { %p184_p4 = pnand %p183_p3, %p179_p0 }
   0xc   :  { %187 = shalt.err (!%p184_p4)
}
   0xd   :  { %26 = dma.hbm_to_vmem [thread:$0]  %s22_s23, 16, %s24_s25, [#allocation6]  }
   0xe   :  { %s31_s9 = sshll.u32 %s321_s2, 4  ;;  %s255_s10 = smov [#allocation8]   ;;  %s32_s9 = int_to_ptr.hbm [resolvable:$true] %s31_s9 }
   0xf   :  { %s33_s11 = sshll.u32 %s255_s10, 4  ;;  %s256_s12 = smov 128   ;;  %s34_s11 = int_to_ptr.vmem [resolvable:$true] %s33_s11 }
  0x10   :  { %s257_s13 = smov 8  }
  0x11   :  { %39 = dma.hbm_to_vmem [thread:$0]  %s32_s9, 512, %s34_s11, [#allocation9], %s256_s12, %s256_s12, %s257_s13  }
  0x12   :  { %248 = dma.done.wait [#allocation6], 16  }
  0x13   :  { %249 = vsyncadd [#allocation6], 4294967280 }
  0x14   :  { %250 = dma.done.wait [#allocation9], 512  }
  0x15   :  { %251 = vsyncadd [#allocation9], 4294966784  ;;  %vm58_vm0 = vcmask 253952   ;;  %v65_v0 = vld [vmem:[#allocation8 + $0x18] sm:$0xff]  ;;  %v64_v1 = vld [vmem:[#allocation8 + $0x10] sm:$0xff]  ;;  %vm67_vm1 = vcmask 261120  }
  0x16   :  { %83 = vmatpush.msra.mxu0 %v65_v0  ;;  %v57_v2 = vld [vmem:[%s323_s4] sm:$0x1]  ;;  %v63_v3 = vld [vmem:[#allocation8 + $0x8] sm:$0xff]  ;;  %v62_v4 = vld [vmem:[#allocation8] sm:$0xff]  ;;  %s258_s16 = smov 64   ;;  %s260_s4 = smov 32  }
  0x17   :  { %59 = vst.msk [vmem:[#allocation2] sm:$0x1] %vm58_vm0, %v57_v2  ;;  %v66_v6 = vld [vmem:[%s322_s3] sm:$0x1]  ;;  %v61_v9 = vld [vmem:[#allocation5] sm:$0x1] }
  0x18   :  { %84 = vmatpush.msra.mxu0 %v64_v1  ;;  %s259_s3 = smov 96   ;;  %s261_s17 = smov [#allocation10]  }
  0x19   :  { %s146_s18 = sshll.u32 %s261_s17, 4  ;;  %s148_s21 = sshll.u32 %s324_s5, 4  ;;  %s147_s18 = int_to_ptr.vmem [resolvable:$true] %s146_s18  ;;  %s149_s21 = int_to_ptr.hbm [resolvable:$true] %s148_s21 }
  0x1a   :  { %85 = vmatpush.msra.mxu0 %v63_v3 }
  0x1c   :  { %86 = vmatpush.msra.mxu0 %v62_v4 }
  0x1e   :  { %v60_v5 = vld [vmem:[#allocation2] sm:$0x1] }
  0x1f   :  { %160 = vmatmul.msk.f32.vlgmr.msra.gmra.mxu0 %vm67_vm1, %v60_v5 }
  0x9c   :  { %v88_v7 = vpop.f32.mrf.mxu0 }
  0x9d   :  { %v89_v8 = vadd.f32 %v88_v7, %v66_v6 }
  0x9f   :  { %112 = vrot.lane.b32.xlu0 %v89_v8, %s258_s16  ;;  %v91_v10 = vadd.f32 %v89_v8, %v61_v9 }
  0xa1   :  { %v161_v11 = vmul.f32 -1.442695, %v91_v10 }
  0xa3   :  { %170 = vpow2.f32 %v161_v11 }
  0xa9   :  { %v171_v12 = vpop.eup %170 }
  0xaa   :  { %v95_v13 = vadd.f32 1.0, %v171_v12 }
  0xac   :  { %172 = vrcp.f32 %v95_v13  ;;  %v107_v19 = vand.u32 2147483648, %v95_v13  ;;  %vm101_vm3 = vweird.f32 %v95_v13  ;;  %v105_v20 = vand.u32 2147483647, %v95_v13 }
  0xae   :  { %v108_v22 = vor.u32 1.1754944e-38, %v107_v19  ;;  %vm106_vm5 = vcmp.eq.f32.partialorder %v105_v20, 8.507059e+37 }
  0xb2   :  { %v173_v14 = vpop.eup %172 }
  0xb3   :  { %v97_v15 = vmul.f32 %v173_v14, %v95_v13  ;;  %vm102_vm2 = vweird.f32 %v173_v14 }
  0xb4   :  { %vm103_vm4 = vmor %vm101_vm3, %vm102_vm2 }
  0xb5   :  { %v98_v16 = vsub.f32 1.0, %v97_v15 }
  0xb7   :  { %v99_v17 = vmul.f32 %v173_v14, %v98_v16 }
  0xb9   :  { %v100_v18 = vadd.f32 %v173_v14, %v99_v17 }
  0xbb   :  { %v104_v21 = vsel %vm103_vm4, %v173_v14, %v100_v18 }
  0xbc   :  { %v109_v24 = vsel %vm106_vm5, %v108_v22, %v104_v21 }
  0xbd   :  { %v122_v30 = vsub.f32 1.0, %v109_v24 }
 0x111   :  { %v113_v23 = vpop.permute.xlu0 %112 }
 0x112   :  { %v115_v25 = vmul.f32 %v113_v23, %v109_v24 }
 0x114   :  { %117 = vrot.lane.b32.xlu0 %v115_v25, %s258_s16 }
 0x186   :  { %v118_v26 = vpop.permute.xlu0 %117 }
 0x187   :  { %v120_v27 = vadd.f32 %v118_v26, %v61_v9 }
 0x189   :  { %174 = vtanh.f32 %v120_v27 }
 0x18f   :  { %v175_v28 = vpop.eup %174 }
 0x190   :  { %124 = vrot.lane.b32.xlu1 %v175_v28, %s259_s3 }
 0x198   :  { %128 = vrot.lane.b32.xlu1 %v60_v5, %s260_s4 }
 0x202   :  { %v125_v29 = vpop.permute.xlu1 %124 }
 0x203   :  { %v127_v32 = vmul.f32 %v125_v29, %v122_v30 }
 0x20a   :  { %v129_v31 = vpop.permute.xlu1 %128 }
 0x20b   :  { %v131_v33 = vmul.f32 %v129_v31, %v109_v24 }
 0x20d   :  { %v132_v34 = vadd.f32 %v131_v33, %v127_v32 }
 0x20f   :  { %v134_v35 = vperm.slane %v132_v34, 0 }
 0x211   :  { %135 = vrot.lane.b32.xlu2 %v134_v35, %s259_s3 }
 0x26b   :  { %v136_v36 = vpop.permute.xlu2 %135 }
 0x26c   :  { %139 = vst.msk [vmem:[#allocation2] sm:$0x1] %vm58_vm0, %v136_v36 }
 0x26d   :  { %140 = vst.msk [vmem:[#allocation10] sm:$0x1] %vm58_vm0, %v136_v36 }
 0x26e   :  { %151 = dma.vmem_to_hbm [thread:$0]  %s147_s18, 16, %s149_s21, [#allocation7]  }
 0x26f   :  { %252 = dma.done.wait [#allocation7], 16  }
 0x270   :  { %253 = vsyncadd [#allocation7], 4294967280 }
 0x271   :  { %156 = vsyncpa [#allocation6], 1 }
 0x272   :  { %157 = vsyncpa [#allocation9], 1 }
 0x273   :  { %158 = vsyncpa [#allocation7], 1 }

</bundles_post_ra>
